<compile_context>
chip_gen: v5e
topology: v5e:2x2
jax: 0.10.0
libtpu: 0.0.40
codegen_flags: <defaults>
</compile_context>

<pallas_src>
import math
import functools

import jax
import jax.numpy as jnp
from jax.experimental import pallas as pl
from jax.experimental.pallas import tpu as pltpu

MIN_LOG_STD = math.log(1e-6)


def _round_up(x, m):
    return (x + m - 1) // m * m


def _policy_kernel(sb_ref,                       # SMEM scalar prefetch: [scale, bias]
                   state_ref, w1_ref, b1_ref, w2_ref, b2_ref, w3_ref, b3_ref,
                   mean_ref):
    x = state_ref[...]                                                   # bf16 [TB, D_in]

    h1 = jnp.dot(x, w1_ref[...], preferred_element_type=jnp.float32)    # f32 [TB, H]
    h1 = jnp.maximum(h1 + b1_ref[...], 0.0)                             # f32 epilogue

    h2 = jnp.dot(h1.astype(w2_ref.dtype), w2_ref[...],
                 preferred_element_type=jnp.float32)                    # f32 [TB, H]
    h2 = jnp.maximum(h2 + b2_ref[...], 0.0)

    m = jnp.dot(h2.astype(w3_ref.dtype), w3_ref[...],
                preferred_element_type=jnp.float32)                     # f32 [TB, A_pad]
    m = jnp.tanh(m + b3_ref[...])

    scale = sb_ref[0]
    bias = sb_ref[1]
    mean_ref[...] = m * scale + bias                                    # lane-dense store


def prepare_params(p):
    """One-time parameter prep (bf16 casts, bias reshapes, action-lane padding)."""
    H = p["w1"].shape[1]
    A = p["w3"].shape[1]
    A_pad = max(128, _round_up(A, 128))

    w3p = jnp.zeros((H, A_pad), jnp.bfloat16).at[:, :A].set(p["w3"].astype(jnp.bfloat16))
    b3p = jnp.zeros((1, A_pad), jnp.float32).at[0, :A].set(p["b3"].astype(jnp.float32))

    return {
        "w1": p["w1"].astype(jnp.bfloat16),
        "b1": p["b1"].reshape(1, -1).astype(jnp.float32),
        "w2": p["w2"].astype(jnp.bfloat16),
        "b2": p["b2"].reshape(1, -1).astype(jnp.float32),
        "w3": w3p,
        "b3": b3p,
        "log_std": p["log_std"].astype(jnp.float32),
        "scale_bias": jnp.stack([jnp.asarray(p["action_scale"], jnp.float32),
                                 jnp.asarray(p["action_bias"], jnp.float32)]),
    }


@jax.jit
def stochastic_policy_forward(state, params):
    B, D_in = state.shape
    H = params["w1"].shape[1]
    A_pad = params["w3"].shape[1]
    A = params["log_std"].shape[0]

    # Batch tiling: small batches stay in one grid step; big batches tile at 256
    # rows (keeps activations well under v7x's 64 MiB VMEM, gives BlockSpec
    # double-buffering of state/mean behind the matmuls).
    TB = min(256, _round_up(B, 8))
    B_pad = _round_up(B, TB)
    nb = B_pad // TB

    x = state.astype(jnp.bfloat16)
    if B_pad != B:
        x = jnp.pad(x, ((0, B_pad - B), (0, 0)))

    grid_spec = pltpu.PrefetchScalarGridSpec(
        num_scalar_prefetch=1,
        grid=(nb,),
        in_specs=[
            pl.BlockSpec((TB, D_in), lambda i, sb: (i, 0)),    # state tile
            pl.BlockSpec((D_in, H), lambda i, sb: (0, 0)),     # W1 (resident)
            pl.BlockSpec((1, H), lambda i, sb: (0, 0)),        # b1
            pl.BlockSpec((H, H), lambda i, sb: (0, 0)),        # W2 (resident)
            pl.BlockSpec((1, H), lambda i, sb: (0, 0)),        # b2
            pl.BlockSpec((H, A_pad), lambda i, sb: (0, 0)),    # W3 (resident, lane-padded)
            pl.BlockSpec((1, A_pad), lambda i, sb: (0, 0)),    # b3
        ],
        out_specs=pl.BlockSpec((TB, A_pad), lambda i, sb: (i, 0)),
    )

    cost = pl.CostEstimate(
        flops=2 * B_pad * (D_in * H + H * H + H * A_pad),
        transcendentals=B_pad * A_pad,
        bytes_accessed=(x.size * 2
                        + params["w1"].size * 2 + params["w2"].size * 2
                        + params["w3"].size * 2
                        + B_pad * A_pad * 4),
    )

    mean_pad = pl.pallas_call(
        _policy_kernel,
        out_shape=jax.ShapeDtypeStruct((B_pad, A_pad), jnp.float32),
        grid_spec=grid_spec,
        compiler_params=pltpu.CompilerParams(
            dimension_semantics=("parallel",)),
        cost_estimate=cost,
    )(
        params["scale_bias"],
        x,
        params["w1"], params["b1"],
        params["w2"], params["b2"],
        params["w3"], params["b3"],
    )

    mean = mean_pad[:B, :A]

    # std is batch-independent: compute once here (XLA fuses the tiny broadcast).
    log_std = jnp.maximum(params["log_std"], MIN_LOG_STD)
    std = jnp.broadcast_to(jnp.exp(log_std)[None, :], (B, A))
    return mean, std


def _xavier_uniform(key, fan_in, fan_out, dtype=jnp.float32):
    # torch.nn.init.xavier_uniform_ with gain=1
    bound = math.sqrt(6.0 / (fan_in + fan_out))
    return jax.random.uniform(key, (fan_in, fan_out), dtype=dtype,
                              minval=-bound, maxval=bound)


def init_params(key, num_inputs, num_actions, hidden_dim=256):
    k1, k2, k3 = jax.random.split(key, 3)
    return {
        "w1": _xavier_uniform(k1, num_inputs, hidden_dim),
        "b1": jnp.zeros((hidden_dim,), jnp.float32),
        "w2": _xavier_uniform(k2, hidden_dim, hidden_dim),
        "b2": jnp.zeros((hidden_dim,), jnp.float32),
        "w3": _xavier_uniform(k3, hidden_dim, num_actions),
        "b3": jnp.zeros((num_actions,), jnp.float32),
        "log_std": jnp.full((num_actions,), math.log(0.1), jnp.float32),
        # action_space is None in the reference __init__ default path:
        "action_scale": jnp.array(1.0, jnp.float32),
        "action_bias": jnp.array(0.0, jnp.float32),
    }


def reference_forward(state, p):
    h1 = jax.nn.relu(state @ p["w1"] + p["b1"])
    h2 = jax.nn.relu(h1 @ p["w2"] + p["b2"])
    mean = jnp.tanh(h2 @ p["w3"] + p["b3"]) * p["action_scale"] + p["action_bias"]
    log_std = jnp.maximum(p["log_std"], MIN_LOG_STD)
    std = jnp.broadcast_to(jnp.exp(log_std)[None, :], mean.shape)
    return mean, std


if __name__ == "__main__":
    key = jax.random.PRNGKey(0)
    k_param, k_state1, k_state2 = jax.random.split(key, 3)

    num_inputs = 16
    num_actions = 4
    hidden_dim = 256

    params = init_params(k_param, num_inputs, num_actions, hidden_dim)
    prepped = prepare_params(params)

    # Small batch (single grid step)
    state_small = jax.random.normal(k_state1, (8, num_inputs), jnp.float32)
    mean_s, std_s = stochastic_policy_forward(state_small, prepped)
    jax.block_until_ready((mean_s, std_s))

    ref_mean_s, ref_std_s = reference_forward(state_small, params)
    assert mean_s.shape == ref_mean_s.shape
    assert jnp.allclose(mean_s, ref_mean_s, atol=2e-2, rtol=2e-2), "mean mismatch (small batch)"
    assert jnp.allclose(std_s, ref_std_s, atol=1e-6, rtol=1e-6), "std mismatch (small batch)"

    # Larger batch (exercises the batch grid + padding/slicing path)
    state_big = jax.random.normal(k_state2, (272, num_inputs), jnp.float32)
    mean_b, std_b = stochastic_policy_forward(state_big, prepped)
    jax.block_until_ready((mean_b, std_b))

    ref_mean_b, ref_std_b = reference_forward(state_big, params)
    assert mean_b.shape == ref_mean_b.shape
    assert jnp.allclose(mean_b, ref_mean_b, atol=2e-2, rtol=2e-2), "mean mismatch (big batch)"
    assert jnp.allclose(std_b, ref_std_b, atol=1e-6, rtol=1e-6), "std mismatch (big batch)"

    print("KERNEL_OK")
</pallas_src>

<mosaic_0001>
module attributes {stable_mosaic.version = 11 : i64} {
  func.func @_policy_kernel(%arg0: i32, %arg1: memref<2xf32, #tpu.memory_space<smem>>, %arg2: memref<8x16xbf16, #tpu.memory_space<vmem>>, %arg3: memref<16x256xbf16, #tpu.memory_space<vmem>>, %arg4: memref<1x256xf32, #tpu.memory_space<vmem>>, %arg5: memref<256x256xbf16, #tpu.memory_space<vmem>>, %arg6: memref<1x256xf32, #tpu.memory_space<vmem>>, %arg7: memref<256x128xbf16, #tpu.memory_space<vmem>>, %arg8: memref<1x128xf32, #tpu.memory_space<vmem>>, %arg9: memref<8x128xf32, #tpu.memory_space<vmem>>) attributes {dimension_semantics = [#tpu.dimension_semantics<parallel>], iteration_bounds = array<i64: 1>, scalar_prefetch = 1 : i64, scratch_operands = 0 : i64, tpu.core_type = #tpu.core_type<tc>, window_params = [{transform_indices = @transform_0, window_bounds = array<i64: 8, 16>}, {pipeline_mode = #tpu.pipeline_mode<synchronous>, transform_indices = @transform_1, window_bounds = array<i64: 16, 256>}, {pipeline_mode = #tpu.pipeline_mode<synchronous>, transform_indices = @transform_2, window_bounds = array<i64: 1, 256>}, {pipeline_mode = #tpu.pipeline_mode<synchronous>, transform_indices = @transform_3, window_bounds = array<i64: 256, 256>}, {pipeline_mode = #tpu.pipeline_mode<synchronous>, transform_indices = @transform_4, window_bounds = array<i64: 1, 256>}, {pipeline_mode = #tpu.pipeline_mode<synchronous>, transform_indices = @transform_5, window_bounds = array<i64: 256, 128>}, {pipeline_mode = #tpu.pipeline_mode<synchronous>, transform_indices = @transform_6, window_bounds = array<i64: 1, 128>}, {transform_indices = @transform_7, window_bounds = array<i64: 8, 128>}]} {
    %c0 = arith.constant 0 : index
    %c0_0 = arith.constant 0 : index
    %0 = vector.load %arg2[%c0, %c0_0] : memref<8x16xbf16, #tpu.memory_space<vmem>>, vector<8x16xbf16>
    %c0_1 = arith.constant 0 : index
    %c0_2 = arith.constant 0 : index
    %1 = vector.load %arg3[%c0_1, %c0_2] : memref<16x256xbf16, #tpu.memory_space<vmem>>, vector<16x256xbf16>
    %cst = arith.constant dense<0.000000e+00> : vector<8x256xf32>
    %2 = tpu.matmul %0, %1, %cst {dimension_numbers = #tpu.dot_dimension_numbers<[1], [0], [0], [1], [0, 0, 1, 1], [], []>} : vector<8x16xbf16>, vector<16x256xbf16>, vector<8x256xf32> -> vector<8x256xf32>
    %c0_3 = arith.constant 0 : index
    %c0_4 = arith.constant 0 : index
    %3 = vector.load %arg4[%c0_3, %c0_4] : memref<1x256xf32, #tpu.memory_space<vmem>>, vector<1x256xf32>
    %4 = vector.broadcast %3 : vector<1x256xf32> to vector<8x256xf32>
    %5 = arith.addf %2, %4 : vector<8x256xf32>
    %cst_5 = arith.constant 0.000000e+00 : f32
    %6 = vector.broadcast %cst_5 : f32 to vector<8x256xf32>
    %7 = arith.maximumf %5, %6 : vector<8x256xf32>
    %8 = arith.truncf %7 : vector<8x256xf32> to vector<8x256xbf16>
    %c0_6 = arith.constant 0 : index
    %c0_7 = arith.constant 0 : index
    %9 = vector.load %arg5[%c0_6, %c0_7] : memref<256x256xbf16, #tpu.memory_space<vmem>>, vector<256x256xbf16>
    %cst_8 = arith.constant dense<0.000000e+00> : vector<8x256xf32>
    %10 = tpu.matmul %8, %9, %cst_8 {dimension_numbers = #tpu.dot_dimension_numbers<[1], [0], [0], [1], [0, 0, 1, 1], [], []>} : vector<8x256xbf16>, vector<256x256xbf16>, vector<8x256xf32> -> vector<8x256xf32>
    %c0_9 = arith.constant 0 : index
    %c0_10 = arith.constant 0 : index
    %11 = vector.load %arg6[%c0_9, %c0_10] : memref<1x256xf32, #tpu.memory_space<vmem>>, vector<1x256xf32>
    %12 = vector.broadcast %11 : vector<1x256xf32> to vector<8x256xf32>
    %13 = arith.addf %10, %12 : vector<8x256xf32>
    %cst_11 = arith.constant 0.000000e+00 : f32
    %14 = vector.broadcast %cst_11 : f32 to vector<8x256xf32>
    %15 = arith.maximumf %13, %14 : vector<8x256xf32>
    %16 = arith.truncf %15 : vector<8x256xf32> to vector<8x256xbf16>
    %c0_12 = arith.constant 0 : index
    %c0_13 = arith.constant 0 : index
    %17 = vector.load %arg7[%c0_12, %c0_13] : memref<256x128xbf16, #tpu.memory_space<vmem>>, vector<256x128xbf16>
    %cst_14 = arith.constant dense<0.000000e+00> : vector<8x128xf32>
    %18 = tpu.matmul %16, %17, %cst_14 {dimension_numbers = #tpu.dot_dimension_numbers<[1], [0], [0], [1], [0, 0, 1, 1], [], []>} : vector<8x256xbf16>, vector<256x128xbf16>, vector<8x128xf32> -> vector<8x128xf32>
    %c0_15 = arith.constant 0 : index
    %c0_16 = arith.constant 0 : index
    %19 = vector.load %arg8[%c0_15, %c0_16] : memref<1x128xf32, #tpu.memory_space<vmem>>, vector<1x128xf32>
    %20 = vector.broadcast %19 : vector<1x128xf32> to vector<8x128xf32>
    %21 = arith.addf %18, %20 : vector<8x128xf32>
    %22 = math.tanh %21 : vector<8x128xf32>
    %c0_17 = arith.constant 0 : index
    %23 = memref.load %arg1[%c0_17] : memref<2xf32, #tpu.memory_space<smem>>
    %c1 = arith.constant 1 : index
    %24 = memref.load %arg1[%c1] : memref<2xf32, #tpu.memory_space<smem>>
    %25 = vector.broadcast %23 : f32 to vector<8x128xf32>
    %26 = arith.mulf %22, %25 : vector<8x128xf32>
    %27 = vector.broadcast %24 : f32 to vector<8x128xf32>
    %28 = arith.addf %26, %27 : vector<8x128xf32>
    %c0_18 = arith.constant 0 : index
    %c0_19 = arith.constant 0 : index
    %29 = vector.load %arg9[%c0_18, %c0_19] : memref<8x128xf32, #tpu.memory_space<vmem>>, vector<8x128xf32>
    tpu.vector_store %arg9[%c0_18, %c0_19], %28 {strides = array<i32>} : memref<8x128xf32, #tpu.memory_space<vmem>>, vector<8x128xf32>,
    return
  }
  func.func @transform_0(%arg0: i32, %arg1: memref<2xf32, #tpu.memory_space<smem>>) -> (i32, i32) {
    %c0_i32 = arith.constant 0 : i32
    %c0_i32_0 = arith.constant 0 : i32
    return %arg0, %c0_i32 : i32, i32
  }
  func.func @transform_1(%arg0: i32, %arg1: memref<2xf32, #tpu.memory_space<smem>>) -> (i32, i32) {
    %c0_i32 = arith.constant 0 : i32
    %c0_i32_0 = arith.constant 0 : i32
    %c0_i32_1 = arith.constant 0 : i32
    return %c0_i32, %c0_i32_0 : i32, i32
  }
  func.func @transform_2(%arg0: i32, %arg1: memref<2xf32, #tpu.memory_space<smem>>) -> (i32, i32) {
    %c0_i32 = arith.constant 0 : i32
    %c0_i32_0 = arith.constant 0 : i32
    %c0_i32_1 = arith.constant 0 : i32
    return %c0_i32, %c0_i32_0 : i32, i32
  }
  func.func @transform_3(%arg0: i32, %arg1: memref<2xf32, #tpu.memory_space<smem>>) -> (i32, i32) {
    %c0_i32 = arith.constant 0 : i32
    %c0_i32_0 = arith.constant 0 : i32
    %c0_i32_1 = arith.constant 0 : i32
    return %c0_i32, %c0_i32_0 : i32, i32
  }
  func.func @transform_4(%arg0: i32, %arg1: memref<2xf32, #tpu.memory_space<smem>>) -> (i32, i32) {
    %c0_i32 = arith.constant 0 : i32
    %c0_i32_0 = arith.constant 0 : i32
    %c0_i32_1 = arith.constant 0 : i32
    return %c0_i32, %c0_i32_0 : i32, i32
  }
  func.func @transform_5(%arg0: i32, %arg1: memref<2xf32, #tpu.memory_space<smem>>) -> (i32, i32) {
    %c0_i32 = arith.constant 0 : i32
    %c0_i32_0 = arith.constant 0 : i32
    %c0_i32_1 = arith.constant 0 : i32
    return %c0_i32, %c0_i32_0 : i32, i32
  }
  func.func @transform_6(%arg0: i32, %arg1: memref<2xf32, #tpu.memory_space<smem>>) -> (i32, i32) {
    %c0_i32 = arith.constant 0 : i32
    %c0_i32_0 = arith.constant 0 : i32
    %c0_i32_1 = arith.constant 0 : i32
    return %c0_i32, %c0_i32_0 : i32, i32
  }
  func.func @transform_7(%arg0: i32, %arg1: memref<2xf32, #tpu.memory_space<smem>>) -> (i32, i32) {
    %c0_i32 = arith.constant 0 : i32
    %c0_i32_0 = arith.constant 0 : i32
    return %arg0, %c0_i32 : i32, i32
  }
}

</mosaic_0001>

<bundles_post_ra>
// kernel: stochastic_policy_forward.1
= control target key start
LH: loop header
LB: loop body
LE: loop exit
PB: predicated region body
PF: predicated region fallthrough
CT: control target
= control target key end

     0   :  { %s916_s30 = smov [#allocation3]   ;;  %s998_s0 = inlined_call_operand.vmem [shape: f32[2], index: 0, kind: input, shape index: {}]   ;;  %s999_s1 = inlined_call_operand.vmem [shape: bf16[8,16], index: 1, kind: input, shape index: {}]   ;;  %s1000_s2 = inlined_call_operand.hbm [shape: bf16[16,256], index: 2, kind: input, shape index: {}]   ;;  %s1001_s3 = inlined_call_operand.vmem [shape: f32[1,256], index: 3, kind: input, shape index: {}]   ;;  %s1002_s4 = inlined_call_operand.hbm [shape: bf16[256,256], index: 4, kind: input, shape index: {}]   ;;  %s1003_s5 = inlined_call_operand.vmem [shape: f32[1,256], index: 5, kind: input, shape index: {}]   ;;  %s1004_s6 = inlined_call_operand.hbm [shape: bf16[256,128], index: 6, kind: input, shape index: {}]   ;;  %s1005_s7 = inlined_call_operand.vmem [shape: f32[1,128], index: 7, kind: input, shape index: {}]   ;;  %s1006_s8 = inlined_call_operand.vmem [shape: f32[8,128], index: 8, kind: output, shape index: {}]  }
   0x1   :  { %s14_s29 = sshll.u32 %s998_s0, 4  ;;  %s15_s29 = int_to_ptr.vmem [resolvable:$true] %s14_s29 }
   0x2   :  { %17 = dma.vmem_to_smem %s15_s29, 16, %s916_s30, [#allocation2] }
   0x3   :  { %910 = dma.done.wait [#allocation2], 16 }
   0x4   :  { %911 = vsyncadd [#allocation2], 4294967280 }
   0x5   :  { %20 = sfence }
   0x6   :  { %21 = vsyncpa [#allocation5], 0 }
   0x7   :  { %22 = vsyncpa [#allocation7], 0  ;;  %s44_s11 = sshll.u32 %s1002_s4, 4  ;;  %s917_s12 = smov [#allocation6]   ;;  %s45_s11 = int_to_ptr.hbm [resolvable:$true] %s44_s11 }
   0x8   :  { %s46_s13 = sshll.u32 %s917_s12, 4  ;;  %s29_s0 = sshll.u32 %s1000_s2, 4  ;;  %s47_s13 = int_to_ptr.vmem [resolvable:$true] %s46_s13  ;;  %s30_s0 = int_to_ptr.hbm [resolvable:$true] %s29_s0 }
   0x9   :  { %s918_s16 = smov 128   ;;  %s919_s17 = smov 8  }
   0xa   :  { %52 = dma.hbm_to_vmem [thread:$0]  %s45_s11, 4096, %s47_s13, [#allocation7], %s918_s16, %s918_s16, %s919_s17  }
   0xb   :  { %s920_s18 = smov [#allocation4]   ;;  %s59_s22 = sshll.u32 %s1004_s6, 4  ;;  %s60_s22 = int_to_ptr.hbm [resolvable:$true] %s59_s22 }
   0xc   :  { %s31_s19 = sshll.u32 %s920_s18, 4  ;;  %s921_s4 = smov [#allocation8]   ;;  %s32_s19 = int_to_ptr.vmem [resolvable:$true] %s31_s19 }
   0xd   :  { %37 = dma.hbm_to_vmem [thread:$0]  %s30_s0, 256, %s32_s19, [#allocation5], %s918_s16, %s918_s16, %s919_s17  }
   0xe   :  { %s61_s23 = sshll.u32 %s921_s4, 4  ;;  %s922_s24 = smov 64   ;;  %s62_s23 = int_to_ptr.vmem [resolvable:$true] %s61_s23 }
   0xf   :  { %s923_s25 = smov 4  }
  0x10   :  { %67 = dma.hbm_to_vmem [thread:$0]  %s60_s22, 2048, %s62_s23, [#allocation7], %s922_s24, %s922_s24, %s923_s25  }
  0x11   :  { %912 = dma.done.wait [#allocation5], 256  }
  0x12   :  { %913 = vsyncadd [#allocation5], 4294967040 }
  0x13   :  { %914 = dma.done.wait [#allocation7], 6144  }
  0x14   :  { %915 = vsyncadd [#allocation7], 4294961152  ;;  %vm102_vm0 = vcmask 130048   ;;  %v564_v0 = vld [vmem:[#allocation4] sm:$0xf]  ;;  %s549_s29 = sld [smem:[#allocation3]] }
  0x15   :  { %v766_v1 = vld [vmem:[#allocation4 + $0x4] sm:$0xf0]  ;;  %v765_v2 = vld [vmem:[#allocation4 + $0x4] sm:$0xf]  ;;  %v566_v4 = vld [vmem:[#allocation4 + $0x8] sm:$0xf0] }
  0x16   :  { %v565_v3 = vor.u32 %v766_v1, %v564_v0  ;;  %v83_v5 = vld [vmem:[%s999_s1] sm:$0xf]  ;;  %v569_v7 = vor.u32 %v765_v2, %v566_v4  ;;  %v782_v8 = vld [vmem:[#allocation6 + $0x74] sm:$0xf0]  ;;  %v781_v13 = vld [vmem:[#allocation6 + $0x74] sm:$0xf] }
  0x17   :  { %v630_v6 = vld [vmem:[#allocation6 + $0x70] sm:$0xf]  ;;  %v798_v10 = vld [vmem:[#allocation6 + $0xf4] sm:$0xf0]  ;;  %v632_v14 = vld [vmem:[#allocation6 + $0x78] sm:$0xf0] }
  0x18   :  { %v694_v9 = vld [vmem:[#allocation6 + $0xf0] sm:$0xf]  ;;  %113 = vmatpush.bf16.msra.mxu0 %v565_v3  ;;  %v631_v11 = vor.u32 %v782_v8, %v630_v6  ;;  %v797_v15 = vld [vmem:[#allocation6 + $0xf4] sm:$0xf]  ;;  %126 = vmatpush.bf16.msra.mxu1 %v569_v7  ;;  %v635_v16 = vor.u32 %v781_v13, %v632_v14  ;;  %v696_v17 = vld [vmem:[#allocation6 + $0xf8] sm:$0xf0] }
  0x19   :  { %v695_v12 = vor.u32 %v798_v10, %v694_v9  ;;  %v622_v18 = vld [vmem:[#allocation6 + $0x60] sm:$0xf]  ;;  %v780_v19 = vld [vmem:[#allocation6 + $0x64] sm:$0xf0]  ;;  %v699_v20 = vor.u32 %v797_v15, %v696_v17  ;;  %v779_v24 = vld [vmem:[#allocation6 + $0x64] sm:$0xf] }
  0x1a   :  { %334 = vmatpush.bf16.msra.mxu2 %v631_v11  ;;  %v623_v21 = vor.u32 %v780_v19, %v622_v18  ;;  %v686_v22 = vld [vmem:[#allocation6 + $0xe0] sm:$0xf]  ;;  %v796_v23 = vld [vmem:[#allocation6 + $0xe4] sm:$0xf0]  ;;  %v624_v26 = vld [vmem:[#allocation6 + $0x68] sm:$0xf0] }
  0x1b   :  { %347 = vmatpush.bf16.msra.mxu3 %v695_v12  ;;  %570 = vmatmul.msk.bf16.vlgmr.msra.gmra.mxu0 %vm102_vm0, %v83_v5  ;;  %v687_v25 = vor.u32 %v796_v23, %v686_v22  ;;  %v795_v27 = vld [vmem:[#allocation6 + $0xe4] sm:$0xf]  ;;  %v688_v28 = vld [vmem:[#allocation6 + $0xe8] sm:$0xf0]  ;;  %v627_v29 = vor.u32 %v779_v24, %v624_v26  ;;  %v614_v30 = vld [vmem:[#allocation6 + $0x50] sm:$0xf] }
  0x1c   :  { %571 = vmatmul.msk.bf16.vlgmr.msra.gmra.mxu1 %vm102_vm0, %v83_v5  ;;  %360 = vmatpush.bf16.msrb.mxu0 %v635_v16  ;;  %v778_v31 = vld [vmem:[#allocation6 + $0x54] sm:$0xf0]  ;;  %v678_v32 = vld [vmem:[#allocation6 + $0xd0] sm:$0xf]  ;;  %v691_v33 = vor.u32 %v795_v27, %v688_v28  ;;  %v777_v35 = vld [vmem:[#allocation6 + $0x54] sm:$0xf] }
  0x1d   :  { %373 = vmatpush.bf16.msrb.mxu1 %v699_v20  ;;  %v794_v34 = vld [vmem:[#allocation6 + $0xd4] sm:$0xf0]  ;;  %v616_v36 = vld [vmem:[#allocation6 + $0x58] sm:$0xf0]  ;;  %v615_v37 = vor.u32 %v778_v31, %v614_v30  ;;  %v793_v39 = vld [vmem:[#allocation6 + $0xd4] sm:$0xf] }
  0x1e   :  { %335 = vmatpush.bf16.msra.mxu2 %v623_v21  ;;  %v679_v38 = vor.u32 %v794_v34, %v678_v32  ;;  %v680_v40 = vld [vmem:[#allocation6 + $0xd8] sm:$0xf0]  ;;  %v606_v41 = vld [vmem:[#allocation6 + $0x40] sm:$0xf]  ;;  %v776_v42 = vld [vmem:[#allocation6 + $0x44] sm:$0xf0]  ;;  %v619_v45 = vor.u32 %v777_v35, %v616_v36 }
  0x1f   :  { %348 = vmatpush.bf16.msra.mxu3 %v687_v25  ;;  %v670_v43 = vld [vmem:[#allocation6 + $0xc0] sm:$0xf]  ;;  %v792_v44 = vld [vmem:[#allocation6 + $0xc4] sm:$0xf0]  ;;  %v683_v46 = vor.u32 %v793_v39, %v680_v40  ;;  %v775_v47 = vld [vmem:[#allocation6 + $0x44] sm:$0xf]  ;;  %v607_v49 = vor.u32 %v776_v42, %v606_v41 }
  0x20   :  { %361 = vmatpush.bf16.msrb.mxu0 %v627_v29  ;;  %v608_v48 = vld [vmem:[#allocation6 + $0x48] sm:$0xf0]  ;;  %v671_v50 = vor.u32 %v792_v44, %v670_v43  ;;  %v791_v51 = vld [vmem:[#allocation6 + $0xc4] sm:$0xf]  ;;  %v598_v53 = vld [vmem:[#allocation6 + $0x30] sm:$0xf] }
  0x21   :  { %374 = vmatpush.bf16.msrb.mxu1 %v691_v33  ;;  %v672_v52 = vld [vmem:[#allocation6 + $0xc8] sm:$0xf0]  ;;  %v774_v54 = vld [vmem:[#allocation6 + $0x34] sm:$0xf0]  ;;  %v662_v55 = vld [vmem:[#allocation6 + $0xb0] sm:$0xf]  ;;  %v611_v57 = vor.u32 %v775_v47, %v608_v48 }
  0x22   :  { %336 = vmatpush.bf16.msra.mxu2 %v615_v37  ;;  %v790_v56 = vld [vmem:[#allocation6 + $0xb4] sm:$0xf0]  ;;  %v675_v58 = vor.u32 %v791_v51, %v672_v52  ;;  %v773_v59 = vld [vmem:[#allocation6 + $0x34] sm:$0xf]  ;;  %v600_v60 = vld [vmem:[#allocation6 + $0x38] sm:$0xf0]  ;;  %v599_v62 = vor.u32 %v774_v54, %v598_v53 }
  0x23   :  { %349 = vmatpush.bf16.msra.mxu3 %v679_v38  ;;  %v789_v61 = vld [vmem:[#allocation6 + $0xb4] sm:$0xf]  ;;  %v663_v63 = vor.u32 %v790_v56, %v662_v55  ;;  %v664_v0 = vld [vmem:[#allocation6 + $0xb8] sm:$0xf0]  ;;  %v590_v1 = vld [vmem:[#allocation6 + $0x20] sm:$0xf]  ;;  %v603_v5 = vor.u32 %v773_v59, %v600_v60 }
  0x24   :  { %362 = vmatpush.bf16.msrb.mxu0 %v619_v45  ;;  %v772_v2 = vld [vmem:[#allocation6 + $0x24] sm:$0xf0]  ;;  %v654_v3 = vld [vmem:[#allocation6 + $0xa0] sm:$0xf]  ;;  %v667_v6 = vor.u32 %v789_v61, %v664_v0  ;;  %v771_v7 = vld [vmem:[#allocation6 + $0x24] sm:$0xf] }
  0x25   :  { %375 = vmatpush.bf16.msrb.mxu1 %v683_v46  ;;  %v788_v4 = vld [vmem:[#allocation6 + $0xa4] sm:$0xf0]  ;;  %v592_v8 = vld [vmem:[#allocation6 + $0x28] sm:$0xf0]  ;;  %v591_v9 = vor.u32 %v772_v2, %v590_v1  ;;  %v787_v11 = vld [vmem:[#allocation6 + $0xa4] sm:$0xf] }
  0x26   :  { %337 = vmatpush.bf16.msra.mxu2 %v607_v49  ;;  %v655_v10 = vor.u32 %v788_v4, %v654_v3  ;;  %v656_v12 = vld [vmem:[#allocation6 + $0xa8] sm:$0xf0]  ;;  %v595_v13 = vor.u32 %v771_v7, %v592_v8  ;;  %v582_v15 = vld [vmem:[#allocation6 + $0x10] sm:$0xf]  ;;  %v770_v16 = vld [vmem:[#allocation6 + $0x14] sm:$0xf0] }
  0x27   :  { %350 = vmatpush.bf16.msra.mxu3 %v671_v50  ;;  %v659_v14 = vor.u32 %v787_v11, %v656_v12  ;;  %v646_v17 = vld [vmem:[#allocation6 + $0x90] sm:$0xf]  ;;  %v583_v18 = vor.u32 %v770_v16, %v582_v15  ;;  %v786_v19 = vld [vmem:[#allocation6 + $0x94] sm:$0xf0]  ;;  %v769_v20 = vld [vmem:[#allocation6 + $0x14] sm:$0xf] }
  0x28   :  { %363 = vmatpush.bf16.msrb.mxu0 %v611_v57  ;;  %v584_v21 = vld [vmem:[#allocation6 + $0x18] sm:$0xf0]  ;;  %v647_v22 = vor.u32 %v786_v19, %v646_v17  ;;  %v785_v24 = vld [vmem:[#allocation6 + $0x94] sm:$0xf]  ;;  %v574_v27 = vld [vmem:[#allocation6] sm:$0xf] }
  0x29   :  { %376 = vmatpush.bf16.msrb.mxu1 %v675_v58  ;;  %v587_v23 = vor.u32 %v769_v20, %v584_v21  ;;  %v648_v25 = vld [vmem:[#allocation6 + $0x98] sm:$0xf0]  ;;  %v768_v28 = vld [vmem:[#allocation6 + $0x4] sm:$0xf0]  ;;  %v638_v29 = vld [vmem:[#allocation6 + $0x80] sm:$0xf] }
  0x2a   :  { %338 = vmatpush.bf16.msra.mxu2 %v599_v62  ;;  %v651_v26 = vor.u32 %v785_v24, %v648_v25  ;;  %v575_v30 = vor.u32 %v768_v28, %v574_v27  ;;  %v784_v31 = vld [vmem:[#allocation6 + $0x84] sm:$0xf0]  ;;  %v767_v32 = vld [vmem:[#allocation6 + $0x4] sm:$0xf]  ;;  %v576_v33 = vld [vmem:[#allocation6 + $0x8] sm:$0xf0] }
  0x2b   :  { %351 = vmatpush.bf16.msra.mxu3 %v663_v63  ;;  %v639_v34 = vor.u32 %v784_v31, %v638_v29  ;;  %v579_v35 = vor.u32 %v767_v32, %v576_v33  ;;  %v783_v36 = vld [vmem:[#allocation6 + $0x84] sm:$0xf]  ;;  %v640_v37 = vld [vmem:[#allocation6 + $0x88] sm:$0xf0]  ;;  %v814_v39 = vld [vmem:[#allocation8 + $0x78] sm:$0xff]  ;;  %s764_s30 = sld [smem:[#allocation3 + $0x1]] }
  0x2c   :  { %364 = vmatpush.bf16.msrb.mxu0 %v603_v5  ;;  %v643_v38 = vor.u32 %v783_v36, %v640_v37  ;;  %v806_v40 = vld [vmem:[#allocation8 + $0x38] sm:$0xff]  ;;  %v813_v41 = vld [vmem:[#allocation8 + $0x70] sm:$0xff]  ;;  %v812_v43 = vld [vmem:[#allocation8 + $0x68] sm:$0xff] }
  0x2d   :  { %377 = vmatpush.bf16.msrb.mxu1 %v667_v6  ;;  %v805_v42 = vld [vmem:[#allocation8 + $0x30] sm:$0xff]  ;;  %v804_v44 = vld [vmem:[#allocation8 + $0x28] sm:$0xff]  ;;  %v811_v45 = vld [vmem:[#allocation8 + $0x60] sm:$0xff] }
  0x2e   :  { %339 = vmatpush.bf16.msra.mxu2 %v591_v9  ;;  %v803_v46 = vld [vmem:[#allocation8 + $0x20] sm:$0xff]  ;;  %v810_v47 = vld [vmem:[#allocation8 + $0x58] sm:$0xff]  ;;  %v86_v48 = vld [vmem:[%s1001_s3] sm:$0x3] }
  0x2f   :  { %352 = vmatpush.bf16.msra.mxu3 %v655_v10  ;;  %v809_v49 = vld [vmem:[#allocation8 + $0x50] sm:$0xff]  ;;  %v88_v50 = vperm.slane %v86_v48, 0  ;;  %v89_v51 = vperm.slane %v86_v48, 1  ;;  %v802_v62 = vld [vmem:[#allocation8 + $0x18] sm:$0xff]  ;;  %v808_v63 = vld [vmem:[#allocation8 + $0x48] sm:$0xff] }
  0x30   :  { %365 = vmatpush.bf16.msrb.mxu0 %v595_v13  ;;  %v801_v0 = vld [vmem:[#allocation8 + $0x10] sm:$0xff]  ;;  %v807_v1 = vld [vmem:[#allocation8 + $0x40] sm:$0xff]  ;;  %v800_v2 = vld [vmem:[#allocation8 + $0x8] sm:$0xff] }
  0x31   :  { %378 = vmatpush.bf16.msrb.mxu1 %v659_v14  ;;  %v799_v3 = vld [vmem:[#allocation8] sm:$0xff]  ;;  %v168_v4 = vld [vmem:[%s1003_s5] sm:$0x3]  ;;  %v553_v32 = vstv %s764_s30 }
  0x32   :  { %340 = vmatpush.bf16.msra.mxu2 %v583_v18  ;;  %v171_v5 = vperm.slane %v168_v4, 1  ;;  %v170_v10 = vperm.slane %v168_v4, 0  ;;  %v823_v24 = vld [vmem:[%s1005_s7] ss:$0 sm:$0xff] }
  0x33   :  { %353 = vmatpush.bf16.msra.mxu3 %v647_v22 }
  0x34   :  { %366 = vmatpush.bf16.msrb.mxu0 %v587_v23 }
  0x35   :  { %379 = vmatpush.bf16.msrb.mxu1 %v651_v26 }
  0x36   :  { %341 = vmatpush.bf16.msra.mxu2 %v575_v30  ;;  %v551_v30 = vstv %s549_s29 }
  0x37   :  { %354 = vmatpush.bf16.msra.mxu3 %v639_v34 }
  0x38   :  { %367 = vmatpush.bf16.msrb.mxu0 %v579_v35 }
  0x39   :  { %380 = vmatpush.bf16.msrb.mxu1 %v643_v38 }
  0x3a   :  { %522 = vmatpush.bf16.msrb.mxu2 %v806_v40 }
  0x3b   :  { %535 = vmatpush.bf16.msrb.mxu3 %v814_v39 }
  0x3e   :  { %523 = vmatpush.bf16.msrb.mxu2 %v805_v42 }
  0x3f   :  { %536 = vmatpush.bf16.msrb.mxu3 %v813_v41 }
  0x42   :  { %524 = vmatpush.bf16.msrb.mxu2 %v804_v44 }
  0x43   :  { %537 = vmatpush.bf16.msrb.mxu3 %v812_v43 }
  0x46   :  { %525 = vmatpush.bf16.msrb.mxu2 %v803_v46 }
  0x47   :  { %538 = vmatpush.bf16.msrb.mxu3 %v811_v45 }
  0x4a   :  { %526 = vmatpush.bf16.msrb.mxu2 %v802_v62 }
  0x4b   :  { %539 = vmatpush.bf16.msrb.mxu3 %v810_v47 }
  0x4e   :  { %527 = vmatpush.bf16.msrb.mxu2 %v801_v0 }
  0x4f   :  { %540 = vmatpush.bf16.msrb.mxu3 %v809_v49 }
  0x52   :  { %528 = vmatpush.bf16.msrb.mxu2 %v800_v2 }
  0x53   :  { %541 = vmatpush.bf16.msrb.mxu3 %v808_v63 }
  0x56   :  { %529 = vmatpush.bf16.msrb.mxu2 %v799_v3 }
  0x57   :  { %542 = vmatpush.bf16.msrb.mxu3 %v807_v1 }
  0x98   :  { %v115_v52 = vpop.f32.mrf.mxu0 }
  0x99   :  { %v116_v53 = vadd.f32 %v115_v52, %v88_v50  ;;  %v128_v54 = vpop.f32.mrf.mxu1 }
  0x9a   :  { %v129_v55 = vadd.f32 %v128_v54, %v89_v51 }
  0x9b   :  { %v132_v56 = vmax.f32 %v116_v53, 0.0 }
  0x9c   :  { %v133_v57 = vmax.f32 %v129_v55, 0.0 }
  0x9d   :  { %v134_v58 = vpack.c.bf16 %v132_v56, %v132_v56 }
  0x9e   :  { %v135_v59 = vpack.c.bf16 %v133_v57, %v133_v57 }
  0x9f   :  { %342 = vmatmul.bf16.vlgmr.msra.gmra.mxu2 %v134_v58  ;;  %368 = vmatmul.bf16.vlgmr.msrb.gmra.mxu0 %v134_v58 }
  0xa0   :  { %355 = vmatmul.bf16.vlgmr.msra.gmra.mxu3 %v135_v59  ;;  %381 = vmatmul.bf16.vlgmr.msrb.gmra.mxu1 %v135_v59  ;;  %v117_v60 = vpop.f32.mrf.mxu0 }
  0xa1   :  { %v130_v61 = vpop.f32.mrf.mxu1 }
 0x11c   :  { %v369_v6 = vpop.f32.mrf.mxu0 }
 0x11d   :  { %v370_v7 = vadd.f32 %v369_v6, %v171_v5  ;;  %v382_v8 = vpop.f32.mrf.mxu1 }
 0x11f   :  { %v383_v9 = vadd.f32 %v382_v8, %v370_v7 }
 0x121   :  { %v387_v11 = vmax.f32 %v383_v9, 0.0 }
 0x122   :  { %v343_v12 = vpop.f32.mrf.mxu2 }
 0x123   :  { %v389_v13 = vpack.c.bf16 %v387_v11, %v387_v11  ;;  %v344_v14 = vadd.f32 %v343_v12, %v170_v10  ;;  %v356_v15 = vpop.f32.mrf.mxu3 }
 0x124   :  { %v371_v16 = vpop.f32.mrf.mxu0 }
 0x125   :  { %v357_v17 = vadd.f32 %v356_v15, %v344_v14  ;;  %v384_v18 = vpop.f32.mrf.mxu1  ;;  %543 = vmatmul.bf16.vlgmr.msrb.gmra.mxu3 %v389_v13 }
 0x127   :  { %v386_v19 = vmax.f32 %v357_v17, 0.0 }
 0x129   :  { %v388_v20 = vpack.c.bf16 %v386_v19, %v386_v19 }
 0x12a   :  { %v345_v21 = vpop.f32.mrf.mxu2 }
 0x12b   :  { %v358_v22 = vpop.f32.mrf.mxu3  ;;  %530 = vmatmul.bf16.vlgmr.msrb.gmra.mxu2 %v388_v20 }
 0x1a8   :  { %v544_v23 = vpop.f32.mrf.mxu3 }
 0x1ae   :  { %v531_v25 = vpop.f32.mrf.mxu2 }
 0x1af   :  { %v532_v26 = vadd.f32 %v823_v24, %v531_v25 }
 0x1b0   :  { %v546_v27 = vpop.f32.mrf.mxu3 }
 0x1b1   :  { %v545_v28 = vadd.f32 %v544_v23, %v532_v26 }
 0x1b3   :  { %824 = vtanh.f32 %v545_v28 }
 0x1b6   :  { %v533_v29 = vpop.f32.mrf.mxu2 }
 0x1b9   :  { %v825_v31 = vpop.eup %824 }
 0x1ba   :  { %v552_v33 = vmul.f32 %v825_v31, %v551_v30 }
 0x1bc   :  { %v554_v34 = vadd.f32 %v553_v32, %v552_v33 }
 0x1be   :  { %555 = vst [vmem:[%s1006_s8] sm:$0xff] %v554_v34 }
 0x1bf   :  { %560 = vsyncpa [#allocation5], 1 }
 0x1c0   :  { %561 = vsyncpa [#allocation7], 1 }

</bundles_post_ra>
